<compile_context>
chip_gen: v7x
topology: tpu7x:2x2x1
jax: 0.10.0
libtpu: 0.0.40
codegen_flags: <defaults>
</compile_context>

<pallas_src>
import functools

import jax
import jax.numpy as jnp
from jax import lax
from jax.experimental import pallas as pl
from jax.experimental.pallas import tpu as pltpu


# ----------------------------------------------------------------------------
# Pallas kernel: one OpenBA block for a single batch element.
# ----------------------------------------------------------------------------
def _openba_block_kernel(
    x_ref,        # (1, S, Hm)     input hidden states (f32)
    mask_ref,     # (1, S, S)      attention mask, 1.0 = masked (f32)
    sin_ref,      # (1, S, H*Dh)   rotary sin, tiled across heads (f32)
    cos_ref,      # (1, S, H*Dh)   rotary cos, tiled across heads (f32)
    ln1_g_ref,    # (1, Hm)
    ln1_b_ref,    # (1, Hm)
    w_qkv_ref,    # (Hm, 3*H*D)    fused QKV weight, bf16
                  #   column layout: [q half1 | q half2 | k half1 | k half2 | v]
    w_o_ref,      # (H*D, Hm)      fused output projection, bf16 (head-major rows)
    ln2_g_ref,    # (1, Hm)
    ln2_b_ref,    # (1, Hm)
    w_in_ref,     # (Hm, 2F)       fused [w_gate | w_up], bf16
    w_out_ref,    # (F, Hm)        fc_out, bf16
    out_ref,      # (1, S, Hm)     block output (f32)
    *,
    num_heads,
    kv_channels,
):
    H = num_heads
    D = kv_channels
    Dh = D // 2
    HD = H * D
    HDh = H * Dh
    bf16 = jnp.bfloat16

    x = x_ref[0].astype(jnp.float32)          # [S, Hm]
    sin_t = sin_ref[0]                        # [S, H*Dh]
    cos_t = cos_ref[0]                        # [S, H*Dh]

    def layer_norm(v, g, b, eps=1e-5):
        mu = jnp.mean(v, axis=-1, keepdims=True)
        var = jnp.mean((v - mu) ** 2, axis=-1, keepdims=True)
        return (v - mu) * lax.rsqrt(var + eps) * g + b

    # ---- input layernorm ----------------------------------------------------
    ln1 = layer_norm(x, ln1_g_ref[0], ln1_b_ref[0])               # [S, Hm] f32

    # ---- fused QKV projection (one MXU matmul, bf16 in / f32 acc) -----------
    qkv = jnp.dot(ln1.astype(bf16), w_qkv_ref[...],
                  preferred_element_type=jnp.float32)             # [S, 3*H*D]

    q1 = qkv[:, 0 * HDh:1 * HDh]      # [S, H*Dh]  first halves, all heads
    q2 = qkv[:, 1 * HDh:2 * HDh]      # [S, H*Dh]  second halves
    k1 = qkv[:, 2 * HDh:3 * HDh]
    k2 = qkv[:, 3 * HDh:4 * HDh]
    v_flat = qkv[:, 4 * HDh:]         # [S, H*D]   head-major values

    # ---- RoPE once over all heads (lane-dense 2D elementwise, f32) ----------
    #   out[:Dh] = x1*cos - x2*sin ; out[Dh:] = x2*cos + x1*sin
    rq1 = q1 * cos_t - q2 * sin_t
    rq2 = q2 * cos_t + q1 * sin_t
    rk1 = k1 * cos_t - k2 * sin_t
    rk2 = k2 * cos_t + k1 * sin_t

    # ---- stack heads -> [H, S, D] for batched attention ----------------------
    q_hsd = jnp.stack(
        [jnp.concatenate([rq1[:, h * Dh:(h + 1) * Dh],
                          rq2[:, h * Dh:(h + 1) * Dh]], axis=-1)
         for h in range(H)], axis=0).astype(bf16)                  # [H, S, D]
    k_hsd = jnp.stack(
        [jnp.concatenate([rk1[:, h * Dh:(h + 1) * Dh],
                          rk2[:, h * Dh:(h + 1) * Dh]], axis=-1)
         for h in range(H)], axis=0).astype(bf16)                  # [H, S, D]
    v_hsd = jnp.stack(
        [v_flat[:, h * D:(h + 1) * D] for h in range(H)],
        axis=0).astype(bf16)                                       # [H, S, D]

    # ---- batched attention scores + softmax ----------------------------------
    scale = 1.0 / jnp.sqrt(jnp.float32(D))
    scores = jnp.einsum('hqd,hkd->hqk', q_hsd, k_hsd,
                        preferred_element_type=jnp.float32) * scale  # [H, S, S]

    mask_b = mask_ref[0] > 0.5                 # [S, S] bool (compare hoisted)
    scores = jnp.where(mask_b[None], jnp.float32(-10000.0), scores)

    m = jnp.max(scores, axis=-1, keepdims=True)
    e = jnp.exp(scores - m)
    denom = jnp.sum(e, axis=-1, keepdims=True)
    p = e * pl.reciprocal(denom, approx=True)                      # [H, S, S]

    ctx = jnp.einsum('hqk,hkd->hqd', p.astype(bf16), v_hsd,
                     preferred_element_type=jnp.float32)           # [H, S, D]

    # ---- fused output projection: [S, H*D] @ [H*D, Hm] -----------------------
    ctx_flat = jnp.concatenate([ctx[h] for h in range(H)], axis=-1)  # [S, H*D]
    attn = jnp.dot(ctx_flat.astype(bf16), w_o_ref[...],
                   preferred_element_type=jnp.float32)             # [S, Hm]

    # ---- residual + post-attention layernorm ---------------------------------
    ln_input = x + attn
    ln2 = layer_norm(ln_input, ln2_g_ref[0], ln2_b_ref[0])

    # ---- SwiGLU MLP (fused gate|up matmul) ------------------------------------
    F = w_out_ref.shape[0]
    gu = jnp.dot(ln2.astype(bf16), w_in_ref[...],
                 preferred_element_type=jnp.float32)               # [S, 2F]
    gate = gu[:, :F]
    up = gu[:, F:]
    act = gate * jax.nn.sigmoid(gate) * up                         # silu(g)*u
    mlp = jnp.dot(act.astype(bf16), w_out_ref[...],
                  preferred_element_type=jnp.float32)              # [S, Hm]

    # ---- final residual -------------------------------------------------------
    out_ref[0] = (ln_input + mlp).astype(out_ref.dtype)


# ----------------------------------------------------------------------------
# Wrapper: parameter plumbing + pallas_call
# ----------------------------------------------------------------------------
def create_sinusoidal_positions(num_pos: int, dim: int) -> jnp.ndarray:
    inv_freq = 1.0 / (10000.0 ** (jnp.arange(0, dim, 2, dtype=jnp.float32) / dim))
    sinusoid = jnp.einsum("i,j->ij", jnp.arange(num_pos, dtype=jnp.float32), inv_freq)
    return jnp.concatenate([jnp.sin(sinusoid), jnp.cos(sinusoid)], axis=1)  # [P, dim]


def openba_block_pallas(x, attention_mask, position_ids, params, rotary_table):
    """x: [B,S,Hm] f32; attention_mask: [B,S,S] bool (True=masked); position_ids: [B,S] i32."""
    B, S, Hm = x.shape
    H, _, D = params["wq"].shape
    F = params["w_gate"].shape[1]
    Dh = D // 2
    HD = H * D
    HDh = H * Dh

    # --- glue: rotary gather + per-head tiling (plain JAX) -------------------
    sincos = rotary_table[position_ids]               # [B, S, D]
    sin, cos = sincos[..., :Dh], sincos[..., Dh:]     # each [B, S, Dh]
    sin_t = jnp.tile(sin, (1, 1, H))                  # [B, S, H*Dh]
    cos_t = jnp.tile(cos, (1, 1, H))

    # mask as f32 predicate (1.0 = masked).  TODO(synk): at production sizes
    # pass int8/bf16 or generate in-kernel from iota + lengths to cut DMA.
    mask_f = attention_mask.astype(jnp.float32)

    # --- weight re-layout + fusion + bf16 cast (plain JAX, one-time) ---------
    def half_major(w):  # [H, Hm, D] -> [Hm, H*D] with [all first halves | all second halves]
        w1 = jnp.transpose(w[:, :, :Dh], (1, 0, 2)).reshape(Hm, HDh)
        w2 = jnp.transpose(w[:, :, Dh:], (1, 0, 2)).reshape(Hm, HDh)
        return jnp.concatenate([w1, w2], axis=1)

    wq_f = half_major(params["wq"])
    wk_f = half_major(params["wk"])
    wv_f = jnp.transpose(params["wv"], (1, 0, 2)).reshape(Hm, HD)   # head-major
    w_qkv = jnp.concatenate([wq_f, wk_f, wv_f], axis=1).astype(jnp.bfloat16)  # [Hm, 3*H*D]
    w_o = params["wo"].reshape(HD, Hm).astype(jnp.bfloat16)                   # [H*D, Hm]
    w_in = jnp.concatenate([params["w_gate"], params["w_up"]], axis=1).astype(jnp.bfloat16)  # [Hm, 2F]
    w_out = params["w_out"].astype(jnp.bfloat16)                              # [F, Hm]

    full = lambda *shape: pl.BlockSpec(shape, lambda b: (0,) * len(shape))
    per_batch = lambda *shape: pl.BlockSpec((1,) + shape, lambda b: (b,) + (0,) * len(shape))

    grid_spec = pltpu.PrefetchScalarGridSpec(
        num_scalar_prefetch=0,
        grid=(B,),
        in_specs=[
            per_batch(S, Hm),        # x
            per_batch(S, S),         # mask
            per_batch(S, HDh),       # sin (tiled across heads)
            per_batch(S, HDh),       # cos
            full(1, Hm),             # ln1 gamma
            full(1, Hm),             # ln1 beta
            full(Hm, 3 * HD),        # fused QKV weight
            full(HD, Hm),            # fused O weight
            full(1, Hm),             # ln2 gamma
            full(1, Hm),             # ln2 beta
            full(Hm, 2 * F),         # fused gate|up weight
            full(F, Hm),             # fc_out weight
        ],
        out_specs=per_batch(S, Hm),
    )

    kernel = functools.partial(_openba_block_kernel, num_heads=H, kv_channels=D)

    return pl.pallas_call(
        kernel,
        out_shape=jax.ShapeDtypeStruct((B, S, Hm), jnp.float32),
        grid_spec=grid_spec,
        compiler_params=pltpu.CompilerParams(
            dimension_semantics=("parallel",),
            vmem_limit_bytes=48 * 1024 * 1024,
        ),
    )(
        x, mask_f, sin_t, cos_t,
        params["ln1_g"], params["ln1_b"],
        w_qkv, w_o,
        params["ln2_g"], params["ln2_b"],
        w_in, w_out,
    )


# ----------------------------------------------------------------------------
# Pure-JAX reference mirroring the PyTorch module (for a correctness check)
# ----------------------------------------------------------------------------
def openba_block_reference(x, attention_mask, position_ids, params, rotary_table):
    B, S, Hm = x.shape
    H, _, D = params["wq"].shape

    def ln(v, g, b, eps=1e-5):
        mu = jnp.mean(v, axis=-1, keepdims=True)
        var = jnp.mean((v - mu) ** 2, axis=-1, keepdims=True)
        return (v - mu) / jnp.sqrt(var + eps) * g[0] + b[0]

    ln1 = ln(x, params["ln1_g"], params["ln1_b"])

    q = jnp.einsum("bse,hed->bshd", ln1, params["wq"])
    k = jnp.einsum("bse,hed->bshd", ln1, params["wk"])
    v = jnp.einsum("bse,hed->bshd", ln1, params["wv"])

    sincos = rotary_table[position_ids]
    sin, cos = sincos[..., : D // 2], sincos[..., D // 2:]

    def rope(t):
        sinf = jnp.concatenate([sin, sin], -1)[:, :, None, :]
        cosf = jnp.concatenate([cos, cos], -1)[:, :, None, :]
        t1, t2 = t[..., : D // 2], t[..., D // 2:]
        rot = jnp.concatenate([-t2, t1], -1)
        return t * cosf + rot * sinf

    q = rope(q).transpose(0, 2, 1, 3)   # [B,H,S,D]
    k = rope(k).transpose(0, 2, 1, 3)
    v = v.transpose(0, 2, 1, 3)

    scores = jnp.einsum("bhqd,bhkd->bhqk", q, k) / jnp.sqrt(jnp.float32(D))
    scores = jnp.where(attention_mask[:, None, :, :], -10000.0, scores)
    w = jax.nn.softmax(scores, axis=-1)
    ctx = jnp.einsum("bhqk,bhkd->bhqd", w, v).transpose(0, 2, 1, 3).reshape(B, S, H * D)
    attn = ctx @ params["wo"].reshape(H * D, Hm)

    ln_in = x + attn
    ln2 = ln(ln_in, params["ln2_g"], params["ln2_b"])
    gate = ln2 @ params["w_gate"]
    up = ln2 @ params["w_up"]
    mlp = (jax.nn.silu(gate) * up) @ params["w_out"]
    return ln_in + mlp


# ----------------------------------------------------------------------------
if __name__ == "__main__":
    # small config consistent with the module
    B, S = 2, 8
    hidden_size = 32
    num_heads = 4
    kv_channels = 8                     # head dim
    max_seq_length = 16
    config_ffn_hidden = 128
    # SwiGLU sizing rule from the module
    F = int(2 * config_ffn_hidden / 3)
    F = 256 * ((F + 256 - 1) // 256)    # -> 256

    key = jax.random.PRNGKey(0)
    keys = jax.random.split(key, 12)
    init = lambda k, shape, s=0.05: (s * jax.random.normal(k, shape)).astype(jnp.float32)

    params = {
        "ln1_g": jnp.ones((1, hidden_size), jnp.float32),
        "ln1_b": jnp.zeros((1, hidden_size), jnp.float32),
        "wq": init(keys[0], (num_heads, hidden_size, kv_channels)),
        "wk": init(keys[1], (num_heads, hidden_size, kv_channels)),
        "wv": init(keys[2], (num_heads, hidden_size, kv_channels)),
        "wo": init(keys[3], (num_heads, kv_channels, hidden_size)),
        "ln2_g": jnp.ones((1, hidden_size), jnp.float32),
        "ln2_b": jnp.zeros((1, hidden_size), jnp.float32),
        "w_gate": init(keys[4], (hidden_size, F)),
        "w_up": init(keys[5], (hidden_size, F)),
        "w_out": init(keys[6], (F, hidden_size)),
    }

    rotary_table = create_sinusoidal_positions(max_seq_length, kv_channels)

    x = jax.random.normal(keys[7], (B, S, hidden_size), jnp.float32)
    attention_mask = jax.random.bernoulli(keys[8], 0.3, (B, S, S))       # True = masked
    position_ids = jnp.tile(jnp.arange(S, dtype=jnp.int32)[None, :], (B, 1))

    out = openba_block_pallas(x, attention_mask, position_ids, params, rotary_table)
    out = jax.block_until_ready(out)

    ref = openba_block_reference(x, attention_mask, position_ids, params, rotary_table)
    assert out.shape == (B, S, hidden_size)
    # bf16 MXU operands + approx reciprocal => slightly looser tolerance than pure f32
    assert jnp.allclose(out, ref, rtol=2e-2, atol=2e-2), "mismatch vs reference"

    print("KERNEL_OK")
</pallas_src>

<mosaic_0001>
module attributes {stable_mosaic.version = 11 : i64} {
  func.func @_openba_block_kernel(%arg0: i32, %arg1: memref<1x8x32xf32, #tpu.memory_space<vmem>>, %arg2: memref<1x8x8xf32, #tpu.memory_space<vmem>>, %arg3: memref<1x8x16xf32, #tpu.memory_space<vmem>>, %arg4: memref<1x8x16xf32, #tpu.memory_space<vmem>>, %arg5: memref<1x32xf32, #tpu.memory_space<vmem>>, %arg6: memref<1x32xf32, #tpu.memory_space<vmem>>, %arg7: memref<32x96xbf16, #tpu.memory_space<vmem>>, %arg8: memref<32x32xbf16, #tpu.memory_space<vmem>>, %arg9: memref<1x32xf32, #tpu.memory_space<vmem>>, %arg10: memref<1x32xf32, #tpu.memory_space<vmem>>, %arg11: memref<32x512xbf16, #tpu.memory_space<vmem>>, %arg12: memref<256x32xbf16, #tpu.memory_space<vmem>>, %arg13: memref<1x8x32xf32, #tpu.memory_space<vmem>>) attributes {dimension_semantics = [#tpu.dimension_semantics<parallel>], iteration_bounds = array<i64: 2>, scalar_prefetch = 0 : i64, scratch_operands = 0 : i64, tpu.core_type = #tpu.core_type<tc>, window_params = [{transform_indices = @transform_0, window_bounds = array<i64: 1, 8, 32>}, {transform_indices = @transform_1, window_bounds = array<i64: 1, 8, 8>}, {transform_indices = @transform_2, window_bounds = array<i64: 1, 8, 16>}, {transform_indices = @transform_3, window_bounds = array<i64: 1, 8, 16>}, {pipeline_mode = #tpu.pipeline_mode<synchronous>, transform_indices = @transform_4, window_bounds = array<i64: 1, 32>}, {pipeline_mode = #tpu.pipeline_mode<synchronous>, transform_indices = @transform_5, window_bounds = array<i64: 1, 32>}, {pipeline_mode = #tpu.pipeline_mode<synchronous>, transform_indices = @transform_6, window_bounds = array<i64: 32, 96>}, {pipeline_mode = #tpu.pipeline_mode<synchronous>, transform_indices = @transform_7, window_bounds = array<i64: 32, 32>}, {pipeline_mode = #tpu.pipeline_mode<synchronous>, transform_indices = @transform_8, window_bounds = array<i64: 1, 32>}, {pipeline_mode = #tpu.pipeline_mode<synchronous>, transform_indices = @transform_9, window_bounds = array<i64: 1, 32>}, {pipeline_mode = #tpu.pipeline_mode<synchronous>, transform_indices = @transform_10, window_bounds = array<i64: 32, 512>}, {pipeline_mode = #tpu.pipeline_mode<synchronous>, transform_indices = @transform_11, window_bounds = array<i64: 256, 32>}, {transform_indices = @transform_12, window_bounds = array<i64: 1, 8, 32>}]} {
    %c0 = arith.constant 0 : index
    %c0_0 = arith.constant 0 : index
    %c0_1 = arith.constant 0 : index
    %0 = vector.load %arg1[%c0, %c0_0, %c0_1] : memref<1x8x32xf32, #tpu.memory_space<vmem>>, vector<1x8x32xf32>
    %1 = vector.shape_cast %0 : vector<1x8x32xf32> to vector<8x32xf32>
    %c0_2 = arith.constant 0 : index
    %c0_3 = arith.constant 0 : index
    %c0_4 = arith.constant 0 : index
    %2 = vector.load %arg3[%c0_2, %c0_3, %c0_4] : memref<1x8x16xf32, #tpu.memory_space<vmem>>, vector<1x8x16xf32>
    %3 = vector.shape_cast %2 : vector<1x8x16xf32> to vector<8x16xf32>
    %c0_5 = arith.constant 0 : index
    %c0_6 = arith.constant 0 : index
    %c0_7 = arith.constant 0 : index
    %4 = vector.load %arg4[%c0_5, %c0_6, %c0_7] : memref<1x8x16xf32, #tpu.memory_space<vmem>>, vector<1x8x16xf32>
    %5 = vector.shape_cast %4 : vector<1x8x16xf32> to vector<8x16xf32>
    %c0_8 = arith.constant 0 : index
    %c0_9 = arith.constant 0 : index
    %6 = vector.load %arg5[%c0_8, %c0_9] : memref<1x32xf32, #tpu.memory_space<vmem>>, vector<1x32xf32>
    %7 = vector.shape_cast %6 : vector<1x32xf32> to vector<32xf32>
    %c0_10 = arith.constant 0 : index
    %c0_11 = arith.constant 0 : index
    %8 = vector.load %arg6[%c0_10, %c0_11] : memref<1x32xf32, #tpu.memory_space<vmem>>, vector<1x32xf32>
    %9 = vector.shape_cast %8 : vector<1x32xf32> to vector<32xf32>
    %cst = arith.constant dense<0.000000e+00> : vector<8xf32>
    %10 = vector.multi_reduction <add>, %1, %cst [1] : vector<8x32xf32> to vector<8xf32>
    %11 = vector.shape_cast %10 : vector<8xf32> to vector<8x1xf32>
    %cst_12 = arith.constant 3.200000e+01 : f32
    %12 = vector.broadcast %cst_12 : f32 to vector<8x1xf32>
    %13 = arith.divf %11, %12 : vector<8x1xf32>
    %14 = vector.broadcast %13 : vector<8x1xf32> to vector<8x32xf32>
    %15 = arith.subf %1, %14 : vector<8x32xf32>
    %16 = arith.mulf %15, %15 : vector<8x32xf32>
    %cst_13 = arith.constant dense<0.000000e+00> : vector<8xf32>
    %17 = vector.multi_reduction <add>, %16, %cst_13 [1] : vector<8x32xf32> to vector<8xf32>
    %18 = vector.shape_cast %17 : vector<8xf32> to vector<8x1xf32>
    %cst_14 = arith.constant 3.200000e+01 : f32
    %19 = vector.broadcast %cst_14 : f32 to vector<8x1xf32>
    %20 = arith.divf %18, %19 : vector<8x1xf32>
    %21 = vector.broadcast %13 : vector<8x1xf32> to vector<8x32xf32>
    %22 = arith.subf %1, %21 : vector<8x32xf32>
    %cst_15 = arith.constant 9.99999974E-6 : f32
    %23 = vector.broadcast %cst_15 : f32 to vector<8x1xf32>
    %24 = arith.addf %20, %23 : vector<8x1xf32>
    %25 = math.rsqrt %24 : vector<8x1xf32>
    %26 = vector.broadcast %25 : vector<8x1xf32> to vector<8x32xf32>
    %27 = arith.mulf %22, %26 : vector<8x32xf32>
    %28 = vector.shape_cast %7 : vector<32xf32> to vector<1x32xf32>
    %29 = vector.broadcast %28 : vector<1x32xf32> to vector<8x32xf32>
    %30 = arith.mulf %27, %29 : vector<8x32xf32>
    %31 = vector.shape_cast %9 : vector<32xf32> to vector<1x32xf32>
    %32 = vector.broadcast %31 : vector<1x32xf32> to vector<8x32xf32>
    %33 = arith.addf %30, %32 : vector<8x32xf32>
    %34 = arith.truncf %33 : vector<8x32xf32> to vector<8x32xbf16>
    %c0_16 = arith.constant 0 : index
    %c0_17 = arith.constant 0 : index
    %35 = vector.load %arg7[%c0_16, %c0_17] : memref<32x96xbf16, #tpu.memory_space<vmem>>, vector<32x96xbf16>
    %cst_18 = arith.constant dense<0.000000e+00> : vector<8x96xf32>
    %36 = tpu.matmul %34, %35, %cst_18 {dimension_numbers = #tpu.dot_dimension_numbers<[1], [0], [0], [1], [0, 0, 1, 1], [], []>} : vector<8x32xbf16>, vector<32x96xbf16>, vector<8x96xf32> -> vector<8x96xf32>
    %37 = vector.extract_strided_slice %36 {offsets = [0, 0], sizes = [8, 16], strides = [1, 1]} : vector<8x96xf32> to vector<8x16xf32>
    %38 = vector.extract_strided_slice %36 {offsets = [0, 16], sizes = [8, 16], strides = [1, 1]} : vector<8x96xf32> to vector<8x16xf32>
    %39 = vector.extract_strided_slice %36 {offsets = [0, 32], sizes = [8, 16], strides = [1, 1]} : vector<8x96xf32> to vector<8x16xf32>
    %40 = vector.extract_strided_slice %36 {offsets = [0, 48], sizes = [8, 16], strides = [1, 1]} : vector<8x96xf32> to vector<8x16xf32>
    %41 = vector.extract_strided_slice %36 {offsets = [0, 64], sizes = [8, 32], strides = [1, 1]} : vector<8x96xf32> to vector<8x32xf32>
    %42 = arith.mulf %37, %5 : vector<8x16xf32>
    %43 = arith.mulf %38, %3 : vector<8x16xf32>
    %44 = arith.subf %42, %43 : vector<8x16xf32>
    %45 = arith.mulf %38, %5 : vector<8x16xf32>
    %46 = arith.mulf %37, %3 : vector<8x16xf32>
    %47 = arith.addf %45, %46 : vector<8x16xf32>
    %48 = arith.mulf %39, %5 : vector<8x16xf32>
    %49 = arith.mulf %40, %3 : vector<8x16xf32>
    %50 = arith.subf %48, %49 : vector<8x16xf32>
    %51 = arith.mulf %40, %5 : vector<8x16xf32>
    %52 = arith.mulf %39, %3 : vector<8x16xf32>
    %53 = arith.addf %51, %52 : vector<8x16xf32>
    %54 = vector.extract_strided_slice %44 {offsets = [0, 0], sizes = [8, 4], strides = [1, 1]} : vector<8x16xf32> to vector<8x4xf32>
    %55 = vector.extract_strided_slice %47 {offsets = [0, 0], sizes = [8, 4], strides = [1, 1]} : vector<8x16xf32> to vector<8x4xf32>
    %56 = tpu.concatenate %54, %55 in 1 : vector<8x4xf32>, vector<8x4xf32> -> vector<8x8xf32>
    %57 = vector.extract_strided_slice %44 {offsets = [0, 4], sizes = [8, 4], strides = [1, 1]} : vector<8x16xf32> to vector<8x4xf32>
    %58 = vector.extract_strided_slice %47 {offsets = [0, 4], sizes = [8, 4], strides = [1, 1]} : vector<8x16xf32> to vector<8x4xf32>
    %59 = tpu.concatenate %57, %58 in 1 : vector<8x4xf32>, vector<8x4xf32> -> vector<8x8xf32>
    %60 = vector.extract_strided_slice %44 {offsets = [0, 8], sizes = [8, 4], strides = [1, 1]} : vector<8x16xf32> to vector<8x4xf32>
    %61 = vector.extract_strided_slice %47 {offsets = [0, 8], sizes = [8, 4], strides = [1, 1]} : vector<8x16xf32> to vector<8x4xf32>
    %62 = tpu.concatenate %60, %61 in 1 : vector<8x4xf32>, vector<8x4xf32> -> vector<8x8xf32>
    %63 = vector.extract_strided_slice %44 {offsets = [0, 12], sizes = [8, 4], strides = [1, 1]} : vector<8x16xf32> to vector<8x4xf32>
    %64 = vector.extract_strided_slice %47 {offsets = [0, 12], sizes = [8, 4], strides = [1, 1]} : vector<8x16xf32> to vector<8x4xf32>
    %65 = tpu.concatenate %63, %64 in 1 : vector<8x4xf32>, vector<8x4xf32> -> vector<8x8xf32>
    %66 = vector.shape_cast %56 : vector<8x8xf32> to vector<1x8x8xf32>
    %67 = vector.shape_cast %59 : vector<8x8xf32> to vector<1x8x8xf32>
    %68 = vector.shape_cast %62 : vector<8x8xf32> to vector<1x8x8xf32>
    %69 = vector.shape_cast %65 : vector<8x8xf32> to vector<1x8x8xf32>
    %70 = tpu.concatenate %66, %67, %68, %69 in 0 : vector<1x8x8xf32>, vector<1x8x8xf32>, vector<1x8x8xf32>, vector<1x8x8xf32> -> vector<4x8x8xf32>
    %71 = arith.truncf %70 : vector<4x8x8xf32> to vector<4x8x8xbf16>
    %72 = vector.extract_strided_slice %50 {offsets = [0, 0], sizes = [8, 4], strides = [1, 1]} : vector<8x16xf32> to vector<8x4xf32>
    %73 = vector.extract_strided_slice %53 {offsets = [0, 0], sizes = [8, 4], strides = [1, 1]} : vector<8x16xf32> to vector<8x4xf32>
    %74 = tpu.concatenate %72, %73 in 1 : vector<8x4xf32>, vector<8x4xf32> -> vector<8x8xf32>
    %75 = vector.extract_strided_slice %50 {offsets = [0, 4], sizes = [8, 4], strides = [1, 1]} : vector<8x16xf32> to vector<8x4xf32>
    %76 = vector.extract_strided_slice %53 {offsets = [0, 4], sizes = [8, 4], strides = [1, 1]} : vector<8x16xf32> to vector<8x4xf32>
    %77 = tpu.concatenate %75, %76 in 1 : vector<8x4xf32>, vector<8x4xf32> -> vector<8x8xf32>
    %78 = vector.extract_strided_slice %50 {offsets = [0, 8], sizes = [8, 4], strides = [1, 1]} : vector<8x16xf32> to vector<8x4xf32>
    %79 = vector.extract_strided_slice %53 {offsets = [0, 8], sizes = [8, 4], strides = [1, 1]} : vector<8x16xf32> to vector<8x4xf32>
    %80 = tpu.concatenate %78, %79 in 1 : vector<8x4xf32>, vector<8x4xf32> -> vector<8x8xf32>
    %81 = vector.extract_strided_slice %50 {offsets = [0, 12], sizes = [8, 4], strides = [1, 1]} : vector<8x16xf32> to vector<8x4xf32>
    %82 = vector.extract_strided_slice %53 {offsets = [0, 12], sizes = [8, 4], strides = [1, 1]} : vector<8x16xf32> to vector<8x4xf32>
    %83 = tpu.concatenate %81, %82 in 1 : vector<8x4xf32>, vector<8x4xf32> -> vector<8x8xf32>
    %84 = vector.shape_cast %74 : vector<8x8xf32> to vector<1x8x8xf32>
    %85 = vector.shape_cast %77 : vector<8x8xf32> to vector<1x8x8xf32>
    %86 = vector.shape_cast %80 : vector<8x8xf32> to vector<1x8x8xf32>
    %87 = vector.shape_cast %83 : vector<8x8xf32> to vector<1x8x8xf32>
    %88 = tpu.concatenate %84, %85, %86, %87 in 0 : vector<1x8x8xf32>, vector<1x8x8xf32>, vector<1x8x8xf32>, vector<1x8x8xf32> -> vector<4x8x8xf32>
    %89 = arith.truncf %88 : vector<4x8x8xf32> to vector<4x8x8xbf16>
    %90 = vector.extract_strided_slice %41 {offsets = [0, 0], sizes = [8, 8], strides = [1, 1]} : vector<8x32xf32> to vector<8x8xf32>
    %91 = vector.extract_strided_slice %41 {offsets = [0, 8], sizes = [8, 8], strides = [1, 1]} : vector<8x32xf32> to vector<8x8xf32>
    %92 = vector.extract_strided_slice %41 {offsets = [0, 16], sizes = [8, 8], strides = [1, 1]} : vector<8x32xf32> to vector<8x8xf32>
    %93 = vector.extract_strided_slice %41 {offsets = [0, 24], sizes = [8, 8], strides = [1, 1]} : vector<8x32xf32> to vector<8x8xf32>
    %94 = vector.shape_cast %90 : vector<8x8xf32> to vector<1x8x8xf32>
    %95 = vector.shape_cast %91 : vector<8x8xf32> to vector<1x8x8xf32>
    %96 = vector.shape_cast %92 : vector<8x8xf32> to vector<1x8x8xf32>
    %97 = vector.shape_cast %93 : vector<8x8xf32> to vector<1x8x8xf32>
    %98 = tpu.concatenate %94, %95, %96, %97 in 0 : vector<1x8x8xf32>, vector<1x8x8xf32>, vector<1x8x8xf32>, vector<1x8x8xf32> -> vector<4x8x8xf32>
    %99 = arith.truncf %98 : vector<4x8x8xf32> to vector<4x8x8xbf16>
    %cst_19 = arith.constant 8.000000e+00 : f32
    %100 = math.sqrt %cst_19 : f32
    %cst_20 = arith.constant 1.000000e+00 : f32
    %101 = arith.divf %cst_20, %100 : f32
    "tpu.trace_start"() <{level = 10 : i32, message = "hqd,hkd->hqk"}> : () -> ()
    %cst_21 = arith.constant dense<0.000000e+00> : vector<4x8x8xf32>
    %102 = tpu.matmul %71, %89, %cst_21 {dimension_numbers = #tpu.dot_dimension_numbers<[2], [2], [1], [1], [0, 0, 0, 1, 1, 1], [0], [0]>} : vector<4x8x8xbf16>, vector<4x8x8xbf16>, vector<4x8x8xf32> -> vector<4x8x8xf32>
    "tpu.trace_stop"() : () -> ()
    %103 = vector.broadcast %101 : f32 to vector<4x8x8xf32>
    %104 = arith.mulf %102, %103 : vector<4x8x8xf32>
    %c0_22 = arith.constant 0 : index
    %c0_23 = arith.constant 0 : index
    %c0_24 = arith.constant 0 : index
    %105 = vector.load %arg2[%c0_22, %c0_23, %c0_24] : memref<1x8x8xf32, #tpu.memory_space<vmem>>, vector<1x8x8xf32>
    %106 = vector.shape_cast %105 : vector<1x8x8xf32> to vector<8x8xf32>
    %cst_25 = arith.constant 5.000000e-01 : f32
    %107 = vector.broadcast %cst_25 : f32 to vector<8x8xf32>
    %108 = arith.cmpf ogt, %106, %107 : vector<8x8xf32>
    %109 = vector.shape_cast %108 : vector<8x8xi1> to vector<1x8x8xi1>
    %cst_26 = arith.constant -1.000000e+04 : f32
    %110 = vector.shape_cast %109 : vector<1x8x8xi1> to vector<1x8x8xi1>
    %111 = vector.broadcast %110 : vector<1x8x8xi1> to vector<4x8x8xi1>
    %112 = vector.broadcast %cst_26 : f32 to vector<4x8x8xf32>
    %113 = arith.select %111, %112, %104 : vector<4x8x8xi1>, vector<4x8x8xf32>
    %cst_27 = arith.constant dense<0xFF800000> : vector<4x8xf32>
    %114 = vector.multi_reduction <maximumf>, %113, %cst_27 [2] : vector<4x8x8xf32> to vector<4x8xf32>
    %115 = vector.shape_cast %114 : vector<4x8xf32> to vector<4x8x1xf32>
    %116 = vector.broadcast %115 : vector<4x8x1xf32> to vector<4x8x8xf32>
    %117 = arith.subf %113, %116 : vector<4x8x8xf32>
    %118 = math.exp %117 : vector<4x8x8xf32>
    %cst_28 = arith.constant dense<0.000000e+00> : vector<4x8xf32>
    %119 = vector.multi_reduction <add>, %118, %cst_28 [2] : vector<4x8x8xf32> to vector<4x8xf32>
    %120 = vector.shape_cast %119 : vector<4x8xf32> to vector<4x8x1xf32>
    %121 = tpu.reciprocal %120 {approx = true} : vector<4x8x1xf32> -> vector<4x8x1xf32>
    %122 = vector.broadcast %121 : vector<4x8x1xf32> to vector<4x8x8xf32>
    %123 = arith.mulf %118, %122 : vector<4x8x8xf32>
    %124 = arith.truncf %123 : vector<4x8x8xf32> to vector<4x8x8xbf16>
    "tpu.trace_start"() <{level = 10 : i32, message = "hqk,hkd->hqd"}> : () -> ()
    %cst_29 = arith.constant dense<0.000000e+00> : vector<4x8x8xf32>
    %125 = tpu.matmul %124, %99, %cst_29 {dimension_numbers = #tpu.dot_dimension_numbers<[2], [1], [1], [2], [0, 0, 0, 1, 1, 2], [0], [0]>} : vector<4x8x8xbf16>, vector<4x8x8xbf16>, vector<4x8x8xf32> -> vector<4x8x8xf32>
    "tpu.trace_stop"() : () -> ()
    %126 = vector.extract_strided_slice %125 {offsets = [0, 0, 0], sizes = [1, 8, 8], strides = [1, 1, 1]} : vector<4x8x8xf32> to vector<1x8x8xf32>
    %127 = vector.shape_cast %126 : vector<1x8x8xf32> to vector<8x8xf32>
    %128 = vector.extract_strided_slice %125 {offsets = [1, 0, 0], sizes = [1, 8, 8], strides = [1, 1, 1]} : vector<4x8x8xf32> to vector<1x8x8xf32>
    %129 = vector.shape_cast %128 : vector<1x8x8xf32> to vector<8x8xf32>
    %130 = vector.extract_strided_slice %125 {offsets = [2, 0, 0], sizes = [1, 8, 8], strides = [1, 1, 1]} : vector<4x8x8xf32> to vector<1x8x8xf32>
    %131 = vector.shape_cast %130 : vector<1x8x8xf32> to vector<8x8xf32>
    %132 = vector.extract_strided_slice %125 {offsets = [3, 0, 0], sizes = [1, 8, 8], strides = [1, 1, 1]} : vector<4x8x8xf32> to vector<1x8x8xf32>
    %133 = vector.shape_cast %132 : vector<1x8x8xf32> to vector<8x8xf32>
    %134 = tpu.concatenate %127, %129, %131, %133 in 1 : vector<8x8xf32>, vector<8x8xf32>, vector<8x8xf32>, vector<8x8xf32> -> vector<8x32xf32>
    %135 = arith.truncf %134 : vector<8x32xf32> to vector<8x32xbf16>
    %c0_30 = arith.constant 0 : index
    %c0_31 = arith.constant 0 : index
    %136 = vector.load %arg8[%c0_30, %c0_31] : memref<32x32xbf16, #tpu.memory_space<vmem>>, vector<32x32xbf16>
    %cst_32 = arith.constant dense<0.000000e+00> : vector<8x32xf32>
    %137 = tpu.matmul %135, %136, %cst_32 {dimension_numbers = #tpu.dot_dimension_numbers<[1], [0], [0], [1], [0, 0, 1, 1], [], []>} : vector<8x32xbf16>, vector<32x32xbf16>, vector<8x32xf32> -> vector<8x32xf32>
    %138 = arith.addf %1, %137 : vector<8x32xf32>
    %c0_33 = arith.constant 0 : index
    %c0_34 = arith.constant 0 : index
    %139 = vector.load %arg9[%c0_33, %c0_34] : memref<1x32xf32, #tpu.memory_space<vmem>>, vector<1x32xf32>
    %140 = vector.shape_cast %139 : vector<1x32xf32> to vector<32xf32>
    %c0_35 = arith.constant 0 : index
    %c0_36 = arith.constant 0 : index
    %141 = vector.load %arg10[%c0_35, %c0_36] : memref<1x32xf32, #tpu.memory_space<vmem>>, vector<1x32xf32>
    %142 = vector.shape_cast %141 : vector<1x32xf32> to vector<32xf32>
    %cst_37 = arith.constant dense<0.000000e+00> : vector<8xf32>
    %143 = vector.multi_reduction <add>, %138, %cst_37 [1] : vector<8x32xf32> to vector<8xf32>
    %144 = vector.shape_cast %143 : vector<8xf32> to vector<8x1xf32>
    %cst_38 = arith.constant 3.200000e+01 : f32
    %145 = vector.broadcast %cst_38 : f32 to vector<8x1xf32>
    %146 = arith.divf %144, %145 : vector<8x1xf32>
    %147 = vector.broadcast %146 : vector<8x1xf32> to vector<8x32xf32>
    %148 = arith.subf %138, %147 : vector<8x32xf32>
    %149 = arith.mulf %148, %148 : vector<8x32xf32>
    %cst_39 = arith.constant dense<0.000000e+00> : vector<8xf32>
    %150 = vector.multi_reduction <add>, %149, %cst_39 [1] : vector<8x32xf32> to vector<8xf32>
    %151 = vector.shape_cast %150 : vector<8xf32> to vector<8x1xf32>
    %cst_40 = arith.constant 3.200000e+01 : f32
    %152 = vector.broadcast %cst_40 : f32 to vector<8x1xf32>
    %153 = arith.divf %151, %152 : vector<8x1xf32>
    %154 = vector.broadcast %146 : vector<8x1xf32> to vector<8x32xf32>
    %155 = arith.subf %138, %154 : vector<8x32xf32>
    %cst_41 = arith.constant 9.99999974E-6 : f32
    %156 = vector.broadcast %cst_41 : f32 to vector<8x1xf32>
    %157 = arith.addf %153, %156 : vector<8x1xf32>
    %158 = math.rsqrt %157 : vector<8x1xf32>
    %159 = vector.broadcast %158 : vector<8x1xf32> to vector<8x32xf32>
    %160 = arith.mulf %155, %159 : vector<8x32xf32>
    %161 = vector.shape_cast %140 : vector<32xf32> to vector<1x32xf32>
    %162 = vector.broadcast %161 : vector<1x32xf32> to vector<8x32xf32>
    %163 = arith.mulf %160, %162 : vector<8x32xf32>
    %164 = vector.shape_cast %142 : vector<32xf32> to vector<1x32xf32>
    %165 = vector.broadcast %164 : vector<1x32xf32> to vector<8x32xf32>
    %166 = arith.addf %163, %165 : vector<8x32xf32>
    %167 = arith.truncf %166 : vector<8x32xf32> to vector<8x32xbf16>
    %c0_42 = arith.constant 0 : index
    %c0_43 = arith.constant 0 : index
    %168 = vector.load %arg11[%c0_42, %c0_43] : memref<32x512xbf16, #tpu.memory_space<vmem>>, vector<32x512xbf16>
    %cst_44 = arith.constant dense<0.000000e+00> : vector<8x512xf32>
    %169 = tpu.matmul %167, %168, %cst_44 {dimension_numbers = #tpu.dot_dimension_numbers<[1], [0], [0], [1], [0, 0, 1, 1], [], []>} : vector<8x32xbf16>, vector<32x512xbf16>, vector<8x512xf32> -> vector<8x512xf32>
    %170 = vector.extract_strided_slice %169 {offsets = [0, 0], sizes = [8, 256], strides = [1, 1]} : vector<8x512xf32> to vector<8x256xf32>
    %171 = vector.extract_strided_slice %169 {offsets = [0, 256], sizes = [8, 256], strides = [1, 1]} : vector<8x512xf32> to vector<8x256xf32>
    %172 = arith.negf %170 : vector<8x256xf32>
    %173 = math.exp %172 : vector<8x256xf32>
    %cst_45 = arith.constant 1.000000e+00 : f32
    %174 = vector.broadcast %cst_45 : f32 to vector<8x256xf32>
    %175 = arith.addf %174, %173 : vector<8x256xf32>
    %176 = arith.divf %174, %175 : vector<8x256xf32>
    %177 = arith.mulf %170, %176 : vector<8x256xf32>
    %178 = arith.mulf %177, %171 : vector<8x256xf32>
    %179 = arith.truncf %178 : vector<8x256xf32> to vector<8x256xbf16>
    %c0_46 = arith.constant 0 : index
    %c0_47 = arith.constant 0 : index
    %180 = vector.load %arg12[%c0_46, %c0_47] : memref<256x32xbf16, #tpu.memory_space<vmem>>, vector<256x32xbf16>
    %cst_48 = arith.constant dense<0.000000e+00> : vector<8x32xf32>
    %181 = tpu.matmul %179, %180, %cst_48 {dimension_numbers = #tpu.dot_dimension_numbers<[1], [0], [0], [1], [0, 0, 1, 1], [], []>} : vector<8x256xbf16>, vector<256x32xbf16>, vector<8x32xf32> -> vector<8x32xf32>
    %182 = arith.addf %138, %181 : vector<8x32xf32>
    %c0_49 = arith.constant 0 : index
    %c0_50 = arith.constant 0 : index
    %c0_51 = arith.constant 0 : index
    %183 = vector.load %arg13[%c0_49, %c0_50, %c0_51] : memref<1x8x32xf32, #tpu.memory_space<vmem>>, vector<1x8x32xf32>
    %184 = vector.shape_cast %183 : vector<1x8x32xf32> to vector<8x32xf32>
    %185 = vector.shape_cast %182 : vector<8x32xf32> to vector<1x8x32xf32>
    tpu.vector_store %arg13[%c0_49, %c0_50, %c0_51], %185 {strides = array<i32>} : memref<1x8x32xf32, #tpu.memory_space<vmem>>, vector<1x8x32xf32>,
    return
  }
  func.func @transform_0(%arg0: i32) -> (i32, i32, i32) {
    %c0_i32 = arith.constant 0 : i32
    %c0_i32_0 = arith.constant 0 : i32
    %c0_i32_1 = arith.constant 0 : i32
    return %arg0, %c0_i32, %c0_i32_0 : i32, i32, i32
  }
  func.func @transform_1(%arg0: i32) -> (i32, i32, i32) {
    %c0_i32 = arith.constant 0 : i32
    %c0_i32_0 = arith.constant 0 : i32
    %c0_i32_1 = arith.constant 0 : i32
    return %arg0, %c0_i32, %c0_i32_0 : i32, i32, i32
  }
  func.func @transform_2(%arg0: i32) -> (i32, i32, i32) {
    %c0_i32 = arith.constant 0 : i32
    %c0_i32_0 = arith.constant 0 : i32
    %c0_i32_1 = arith.constant 0 : i32
    return %arg0, %c0_i32, %c0_i32_0 : i32, i32, i32
  }
  func.func @transform_3(%arg0: i32) -> (i32, i32, i32) {
    %c0_i32 = arith.constant 0 : i32
    %c0_i32_0 = arith.constant 0 : i32
    %c0_i32_1 = arith.constant 0 : i32
    return %arg0, %c0_i32, %c0_i32_0 : i32, i32, i32
  }
  func.func @transform_4(%arg0: i32) -> (i32, i32) {
    %c0_i32 = arith.constant 0 : i32
    %c0_i32_0 = arith.constant 0 : i32
    %c0_i32_1 = arith.constant 0 : i32
    return %c0_i32, %c0_i32_0 : i32, i32
  }
  func.func @transform_5(%arg0: i32) -> (i32, i32) {
    %c0_i32 = arith.constant 0 : i32
    %c0_i32_0 = arith.constant 0 : i32
    %c0_i32_1 = arith.constant 0 : i32
    return %c0_i32, %c0_i32_0 : i32, i32
  }
  func.func @transform_6(%arg0: i32) -> (i32, i32) {
    %c0_i32 = arith.constant 0 : i32
    %c0_i32_0 = arith.constant 0 : i32
    %c0_i32_1 = arith.constant 0 : i32
    return %c0_i32, %c0_i32_0 : i32, i32
  }
  func.func @transform_7(%arg0: i32) -> (i32, i32) {
    %c0_i32 = arith.constant 0 : i32
    %c0_i32_0 = arith.constant 0 : i32
    %c0_i32_1 = arith.constant 0 : i32
    return %c0_i32, %c0_i32_0 : i32, i32
  }
  func.func @transform_8(%arg0: i32) -> (i32, i32) {
    %c0_i32 = arith.constant 0 : i32
    %c0_i32_0 = arith.constant 0 : i32
    %c0_i32_1 = arith.constant 0 : i32
    return %c0_i32, %c0_i32_0 : i32, i32
  }
  func.func @transform_9(%arg0: i32) -> (i32, i32) {
    %c0_i32 = arith.constant 0 : i32
    %c0_i32_0 = arith.constant 0 : i32
    %c0_i32_1 = arith.constant 0 : i32
    return %c0_i32, %c0_i32_0 : i32, i32
  }
  func.func @transform_10(%arg0: i32) -> (i32, i32) {
    %c0_i32 = arith.constant 0 : i32
    %c0_i32_0 = arith.constant 0 : i32
    %c0_i32_1 = arith.constant 0 : i32
    return %c0_i32, %c0_i32_0 : i32, i32
  }
  func.func @transform_11(%arg0: i32) -> (i32, i32) {
    %c0_i32 = arith.constant 0 : i32
    %c0_i32_0 = arith.constant 0 : i32
    %c0_i32_1 = arith.constant 0 : i32
    return %c0_i32, %c0_i32_0 : i32, i32
  }
  func.func @transform_12(%arg0: i32) -> (i32, i32, i32) {
    %c0_i32 = arith.constant 0 : i32
    %c0_i32_0 = arith.constant 0 : i32
    %c0_i32_1 = arith.constant 0 : i32
    return %arg0, %c0_i32, %c0_i32_0 : i32, i32, i32
  }
}

</mosaic_0001>

<bundles_post_ra>
// kernel: tpu_custom_call.1
= control target key start
LH: loop header
LB: loop body
LE: loop exit
PB: predicated region body
PF: predicated region fallthrough
CT: control target
= control target key end

     0   :  { %s2434_s0 = inlined_call_operand.vmem [shape: f32[2,8,32], index: 0, kind: input, shape index: {}]   ;;  %s2435_s1 = inlined_call_operand.vmem [shape: f32[2,8,8], index: 1, kind: input, shape index: {}]   ;;  %s2436_s2 = inlined_call_operand.vmem [shape: f32[2,8,16], index: 2, kind: input, shape index: {}]   ;;  %s2437_s3 = inlined_call_operand.vmem [shape: f32[2,8,16], index: 3, kind: input, shape index: {}]   ;;  %s2438_s4 = inlined_call_operand.vmem [shape: f32[1,32], index: 4, kind: input, shape index: {}]   ;;  %s2439_s5 = inlined_call_operand.vmem [shape: f32[1,32], index: 5, kind: input, shape index: {}]   ;;  %s2440_s6 = inlined_call_operand.vmem [shape: bf16[32,96], index: 6, kind: input, shape index: {}]   ;;  %s2441_s7 = inlined_call_operand.vmem [shape: bf16[32,32], index: 7, kind: input, shape index: {}]   ;;  %s2442_s8 = inlined_call_operand.vmem [shape: f32[1,32], index: 8, kind: input, shape index: {}]   ;;  %s2443_s9 = inlined_call_operand.vmem [shape: f32[1,32], index: 9, kind: input, shape index: {}]   ;;  %s2444_s10 = inlined_call_operand.vmem [shape: bf16[32,512], index: 10, kind: input, shape index: {}]   ;;  %s2445_s11 = inlined_call_operand.vmem [shape: bf16[256,32], index: 11, kind: input, shape index: {}]   ;;  %s2446_s12 = inlined_call_operand.hbm [shape: f32[2,8,32], index: 12, kind: output, shape index: {}]  }
   0x1   :  { %2449 = sst [smem:[#allocation5_spill]] %s2434_s0 }
   0x2   :  { %2450 = sst [smem:[#allocation6_spill]] %s2436_s2 }
   0x3   :  { %2451 = sst [smem:[#allocation7_spill]] %s2437_s3 }
   0x4   :  { %2452 = sst [smem:[#allocation8_spill]] %s2438_s4 }
   0x5   :  { %17 = vsyncpa [#allocation3], 0 }
   0x6   :  { %19 = vsyncpa [#allocation3 + $0x1], 0  ;;  %s2103_s21 = smov 0   ;;  %s2105_s22 = smov 0  }
   0x7   :  { %s2107_s23 = smov 0   ;;  %s2109_s24 = smov 0  }
   0x8 LB: > { %s2124_s25 = sadd.s32 4294967295, %s2013_s24   ;;  %s1663_s26 = sadd.s32 4294967294, %s2013_s24   ;;  %s2013_s24 = sphi %s2109_s24, %s2463_s24   ;;  %s2009_s23 = sphi %s2107_s23, %s2462_s23   ;;  %s2005_s22 = sphi %s2105_s22, %s2461_s22   ;;  %s2001_s21 = sphi %s2103_s21, %s2460_s21  }
   0x9   : > { %s2128_s27 = sadd.s32 1, %s2013_s24   ;;  %s304_s28 = sadd.s32 1, %s2009_s23 }
   0xa   : > { %s301_s29 = ssub.s32 %s2013_s24, %s2128_s27  ;;  %p314_p0 = scmp.ne.s32.totalorder %s2009_s23, %s2005_s22 }
   0xb   : > { %p302_p1 = scmp.eq.s32.totalorder %s301_s29, 0  ;;  %p315_p2 = scmp.eq.s32.totalorder %s2124_s25, 1 }
   0xc   : > { %p320_p3 = scmp.ne.s32.totalorder %s2005_s22, %s2001_s21  ;;  %p321_p4 = scmp.eq.s32.totalorder %s1663_s26, 1 }
   0xd   : > { %s2139_s30 = scalar_select %p302_p1, %s2009_s23, %s304_s28  }
   0xe   : > { %p2141_p5 = por %p315_p2, %p314_p0  ;;  %p2145_p6 = por %p321_p4, %p320_p3 }
   0xf   : > { %p1666_p7 = scmp.ge.s32.totalorder %s2013_s24, 1  ;;  %p391_p8 = scmp.lt.s32.totalorder %s2013_s24, 3 }
  0x11   : > { %p392_p9 = pnand %p1666_p7, %p391_p8 }
  0x12   : > { %p444_p10 = scmp.lt.s32.totalorder (!%p392_p9), %s2124_s25, 1  ;;  %vm466_vm0 = vcmask (!%p392_p9), 261120   ;;  %s2455_s0 = sld [smem:[#allocation5_spill]] (!%p392_p9)  ;;  %v1891_v7 = vld [vmem:[%s2440_s6] sm:$0xff] (!%p392_p9)   ;;  %v2015_v8 = vmov (!%p392_p9), 0.0   ;;  %vm2016_vm1 = vmmov (!%p392_p9), 0  }
  0x13   : > { %395 = sbr.rel (%p392_p9) target bundleno = 2721 (0xaa1), region = 68  ;;  %1766 = vmatprep.subr.bf16.mxu1 (!%p392_p9), %v2015_v8  ;;  %1770 = vmatprep.mubr.msk.bf16.mxu1 (!%p392_p9), %vm2016_vm1, %v2015_v8  ;;  %v1892_v9 = vld [vmem:[%s2440_s6 + $0x8] sm:$0xff] (!%p392_p9)   ;;  %s2456_s2 = sld [smem:[#allocation6_spill]] (!%p392_p9)  ;;  %v1673_v18 = vld [vmem:[%s2439_s5] ss:$0 sm:$0xff] (!%p392_p9)  ;;  %vm607_vm2 = vcmask (!%p392_p9), 31744  }
  0x14   : > { %1767 = vmatpush3.bf16.msra.mxu1 (!%p392_p9), %v1891_v7  ;;  %1792 = vmatprep.subr.bf16.mxu0 (!%p392_p9), %v2015_v8  ;;  %s2447_s20 = smov (!%p392_p9), 16   ;;  %s2457_s3 = sld [smem:[#allocation7_spill]] (!%p392_p9)  ;;  %vm683_vm3 = vcmask (!%p392_p9), 64512   ;;  %vm934_vm5 = vcmask (!%p392_p9), 1043456   ;;  %vm1138_vm6 = vcmask (!%p392_p9), 130048   ;;  %vm1140_vm7 = vcmask (!%p392_p9), 195584  }
  0x15   : > { %1768 = vmatprep.subr.bf16.mxu1 (!%p392_p9), %v2015_v8  ;;  %1794 = vmatprep.mubr.msk.bf16.mxu0 (!%p392_p9), %vm2016_vm1, %v2015_v8  ;;  %s2458_s4 = sld [smem:[#allocation8_spill]] (!%p392_p9)  ;;  %s2022_s26 = smov (!%p392_p9), 84  }
  0x16   : > { %s2023_s28 = smov (!%p392_p9), 92   ;;  %s2026_s17 = smov (!%p392_p9), 80  }
  0x18   : > { %1769 = vmatpush3.bf16.msra.mxu1 (!%p392_p9), %v1892_v9 }
  0x19   : > { %1774 = vmatprep.subr.bf16.mxu1 (!%p392_p9), %v2015_v8 }
  0x1a   : > { %s445_s15 = scalar_select %p444_p10, %s2124_s25, 1 }
  0x1b   : > { %v1672_v16 = vld [vmem:[%s2458_s4] ss:$0 sm:$0xff]  ;;  %s2032_s4 = smov 104  }
  0x1c   : > { %s2153_s16 = sshll.u32 %s445_s15, 3  ;;  %s2025_s15 = smov 124  }
  0x1d   : > { %s447_s19 = scalar_lea.vmem %s2455_s0, %s2153_s16  ;;  %s455_s18 = scalar_lea.vmem %s2456_s2, %s2153_s16 }
  0x1e   : > { %v2159_v0 = vld [vmem:[%s447_s19] sm:$0xff]  ;;  %s2017_s19 = smov 48   ;;  %s459_s29 = scalar_lea.vmem %s2457_s3, %s2153_s16 }
  0x1f   : > { %v467_v1 = vsel %vm466_vm0, %v2159_v0, 0.0  ;;  %v462_v10 = vld [vmem:[%s455_s18] sm:$0xff]  ;;  %s2019_s0 = smov 32   ;;  %s2027_s18 = smov 88  }
  0x20   : > { %468 = vadd.xlane.f32.xlu0 %v467_v1  ;;  %581 = vrot.lane.b32.xlu1 %v462_v10, %s2017_s19  ;;  %v463_v11 = vld [vmem:[%s459_s29] sm:$0xff]  ;;  %s2024_s29 = smov 116   ;;  %s2029_s2 = smov 120  }
  0x21   : > { %s2031_s3 = smov 108  }
  0x24   : > { %594 = vrot.lane.b32.xlu1 %v462_v10, %s2019_s0 }
  0x28   : > { %577 = vrot.lane.b32.xlu1 %v463_v11, %s2019_s0  ;;  %s2020_s0 = smov 112  }
  0x2c   : > { %590 = vrot.lane.b32.xlu1 %v463_v11, %s2017_s19  ;;  %s2459_s19 = smov 16  }
  0x92   : > { %v582_v22 = vpop.permute.xlu1 %581 }
  0x96   : > { %v595_v30 = vpop.permute.xlu1 %594 }
  0x9a   : > { %v578_v33 = vpop.permute.xlu1 %577 }
  0x9e   : > { %v591_v34 = vpop.permute.xlu1 %590 }
  0xad   : > { %v469_v2 = vpop.xlane.xlu0 %468 }
  0xae   : > { %v471_v3 = vmul.f32 0.03125, %v469_v2 }
  0xb0   : > { %v472_v4 = vsub.f32 %v2159_v0, %v471_v3 }
  0xb2   : > { %v473_v5 = vmul.f32 %v472_v4, %v472_v4 }
  0xb4   : > { %v474_v6 = vsel %vm466_vm0, %v473_v5, 0.0 }
  0xb5   : > { %475 = vadd.xlane.f32.xlu0 %v474_v6 }
  0xcb   : > { %557 = vrot.lane.b32.xlu0 %v462_v10, %s2447_s20  ;;  %s2021_s20 = smov 96  }
 0x142   : > { %v476_v12 = vpop.xlane.xlu0 %475 }
 0x143   : > { %v477_v13 = vmul.f32 0.03125, %v476_v12 }
 0x145   : > { %v478_v14 = vadd.f32 1e-05, %v477_v13 }
 0x146   : > { %v558_v23 = vpop.permute.xlu0 %557 }
 0x147   : > { %1923 = vrsqrt.f32 %v478_v14 }
 0x151   : > { %v1924_v15 = vpop.eup %1923 }
 0x152   : > { %v480_v17 = vmul.f32 %v1924_v15, %v472_v4 }
 0x154   : > { %v487_v19 = vmul.f32 %v1672_v16, %v480_v17 }
 0x156   : > { %v494_v20 = vadd.f32 %v1673_v18, %v487_v19 }
 0x158   : > { %v495_v21 = vpack.c.bf16 %v494_v20, %v494_v20 }
 0x15a   : > { %1771 = vmatmul.mubr.msk.bf16.vlgmr.msra.gmra.mrb[0].mxu1 %vm466_vm0, %v495_v21 }
 0x15b   : > { %1776 = vmatprep.mubr.msk.bf16.mxu1 %vm2016_vm1, %v2015_v8 }
 0x22d   : > { %v2197_v24 = vpop.f32.mrb[0].mxu1 }
 0x22e   : > { %v560_v25 = vmul.f32 %v558_v23, %v2197_v24  ;;  %v1772_v26 = vpop.f32.mrb[1].mxu1  ;;  %v584_v27 = vmul.f32 %v582_v22, %v2197_v24  ;;  %v597_v31 = vmul.f32 %v595_v30, %v2197_v24  ;;  %v571_v32 = vmul.f32 %v2197_v24, %v462_v10 }
 0x22f   : > { %v552_v28 = vpop.f32.mrb[2].mxu1  ;;  %v580_v35 = vmul.f32 %v578_v33, %v2197_v24  ;;  %v593_v38 = vmul.f32 %v591_v34, %v2197_v24  ;;  %v555_v43 = vmul.f32 %v2197_v24, %v463_v11 }
 0x230   : > { %586 = vrot.lane.b32.xlu1 %v584_v27, %s2020_s0  ;;  %v1773_v29 = vpop.f32.mrb[3].mxu1  ;;  %562 = vrot.lane.b32.xlu0 %v560_v25, %s2020_s0 }
 0x234   : > { %599 = vrot.lane.b32.xlu1 %v597_v31, %s2459_s19 }
 0x238   : > { %567 = vrot.lane.b32.xlu1 %v463_v11, %s2459_s19 }
 0x23c   : > { %573 = vrot.lane.b32.xlu1 %v571_v32, %s2459_s19 }
 0x2a2   : > { %v587_v36 = vpop.permute.xlu1 %586  ;;  %v563_v42 = vpop.permute.xlu0 %562 }
 0x2a3   : > { %v589_v37 = vsub.f32 %v580_v35, %v587_v36  ;;  %v565_v46 = vsub.f32 %v555_v43, %v563_v42 }
 0x2a5   : > { %636 = vrot.lane.b32.xlu1 %v589_v37, %s2021_s20  ;;  %s2028_s20 = smov 76  }
 0x2a6   : > { %v600_v39 = vpop.permute.xlu1 %599 }
 0x2a7   : > { %v602_v40 = vadd.f32 %v600_v39, %v593_v38 }
 0x2a9   : > { %640 = vrot.lane.b32.xlu0 %v602_v40, %s2022_s26 }
 0x2aa   : > { %v568_v41 = vpop.permute.xlu1 %567 }
 0x2ab   : > { %v570_v44 = vmul.f32 %v568_v41, %v2197_v24 }
 0x2ad   : > { %644 = vrot.lane.b32.xlu0 %v589_v37, %s2023_s28  ;;  %s2030_s28 = smov 72  }
 0x2ae   : > { %v574_v45 = vpop.permute.xlu1 %573 }
 0x2af   : > { %v576_v47 = vadd.f32 %v574_v45, %v570_v44 }
 0x2b1   : > { %604 = vrot.lane.b32.xlu1 %v576_v47, %s2024_s29  ;;  %610 = vrot.lane.b32.xlu0 %v565_v46, %s2025_s15 }
 0x2b5   : > { %647 = vrot.lane.b32.xlu1 %v602_v40, %s2026_s17  ;;  %651 = vrot.lane.b32.xlu0 %v589_v37, %s2027_s18  ;;  %s2035_s18 = smov 24  }
 0x2b9   : > { %613 = vrot.lane.b32.xlu1 %v576_v47, %s2020_s0  ;;  %658 = vrot.lane.b32.xlu0 %v589_v37, %s2022_s26 }
 0x2bd   : > { %654 = vrot.lane.b32.xlu1 %v602_v40, %s2028_s20  ;;  %617 = vrot.lane.b32.xlu0 %v565_v46, %s2029_s2 }
 0x2c1   : > { %661 = vrot.lane.b32.xlu1 %v602_v40, %s2030_s28  ;;  %624 = vrot.lane.b32.xlu0 %v565_v46, %s2024_s29  ;;  %s451_s29 = scalar_lea.vmem %s2435_s1, %s2153_s16  ;;  %s2033_s16 = smov 64  }
 0x2c2   : > { %v872_v21 = vld [vmem:[%s451_s29] sm:$0xff]  ;;  %s1719_s28 = sshll.u32 %s2124_s25, 7 }
 0x2c3   : > { %vm873_vm4 = vcmp.gt.f32.partialorder %v872_v21, 0.5 }
 0x2c5   : > { %620 = vrot.lane.b32.xlu1 %v576_v47, %s2031_s3 }
 0x2c9   : > { %627 = vrot.lane.b32.xlu1 %v576_v47, %s2032_s4 }
 0x317   : > { %v637_v48 = vpop.permute.xlu1 %636 }
 0x31b   : > { %v641_v49 = vpop.permute.xlu0 %640 }
 0x31c   : > { %v643_v50 = vsel %vm607_vm2, %v637_v48, %v641_v49 }
 0x31d   : > { %v665_v51 = vpack.c.bf16 %v643_v50, %v643_v50 }
 0x31f   : > { %v645_v52 = vpop.permute.xlu0 %644  ;;  %v688_v53 = vsel %vm683_vm3, %v665_v51, 0  ;;  %v679_v51 = vpack.c.bf16 %v2197_v24, %v2197_v24 }
 0x320   : > { %1775 = vmatpush3.bf16.xpose.msra.mxu1 %v688_v53 }
 0x321   : > { %1780 = vmatprep.subr.bf16.mxu1 %v2015_v8 }
 0x323   : > { %v605_v54 = vpop.permute.xlu1 %604  ;;  %v611_v55 = vpop.permute.xlu0 %610 }
 0x324   : > { %v608_v56 = vsel %vm607_vm2, %v565_v46, %v605_v54 }
 0x325   : > { %v631_v57 = vpack.c.bf16 %v608_v56, %v608_v56 }
 0x327   : > { %v648_v58 = vpop.permute.xlu1 %647  ;;  %1777 = vmatmul.mubr.msk.bf16.vlgmr.msra.gmra.mrb[4].mxu1 %vm683_vm3, %v631_v57  ;;  %v652_v61 = vpop.permute.xlu0 %651 }
 0x328   : > { %v650_v59 = vsel %vm607_vm2, %v645_v52, %v648_v58  ;;  %1782 = vmatprep.mubr.msk.bf16.mxu1 %vm2016_vm1, %v2015_v8 }
 0x329   : > { %v666_v60 = vpack.c.bf16 %v650_v59, %v650_v59 }
 0x32b   : > { %v614_v62 = vpop.permute.xlu1 %613  ;;  %v734_v63 = vsel %vm683_vm3, %v666_v60, 0  ;;  %v659_v2 = vpop.permute.xlu0 %658 }
 0x32c   : > { %1781 = vmatpush3.bf16.xpose.msra.mxu1 %v734_v63  ;;  %v616_v1 = vsel %vm607_vm2, %v611_v55, %v614_v62 }
 0x32d   : > { %1786 = vmatprep.subr.bf16.mxu1 %v2015_v8  ;;  %v632_v5 = vpack.c.bf16 %v616_v1, %v616_v1 }
 0x32f   : > { %v655_v3 = vpop.permute.xlu1 %654  ;;  %v618_v11 = vpop.permute.xlu0 %617 }
 0x330   : > { %v657_v4 = vsel %vm607_vm2, %v652_v61, %v655_v3 }
 0x331   : > { %v667_v6 = vpack.c.bf16 %v657_v4, %v657_v4 }
 0x333   : > { %v662_v7 = vpop.permute.xlu1 %661  ;;  %1783 = vmatmul.mubr.msk.bf16.vlgmr.msra.gmra.mrb[8].mxu1 %vm683_vm3, %v632_v5  ;;  %v780_v9 = vsel %vm683_vm3, %v667_v6, 0  ;;  %v625_v17 = vpop.permute.xlu0 %624 }
 0x334   : > { %v664_v10 = vsel %vm607_vm2, %v659_v2, %v662_v7  ;;  %1787 = vmatpush3.bf16.xpose.msra.mxu1 %v780_v9  ;;  %1788 = vmatprep.mubr.msk.bf16.mxu1 %vm2016_vm1, %v2015_v8 }
 0x335   : > { %v668_v12 = vpack.c.bf16 %v664_v10, %v664_v10  ;;  %1798 = vmatprep.subr.bf16.mxu1 %v2015_v8 }
 0x337   : > { %v621_v13 = vpop.permute.xlu1 %620  ;;  %v826_v14 = vsel %vm683_vm3, %v668_v12, 0 }
 0x338   : > { %v623_v15 = vsel %vm607_vm2, %v618_v11, %v621_v13  ;;  %1793 = vmatpush3.bf16.xpose.msra.mxu0 %v826_v14 }
 0x339   : > { %v633_v16 = vpack.c.bf16 %v623_v15, %v623_v15  ;;  %1804 = vmatprep.subr.bf16.mxu0 %v2015_v8 }
 0x33b   : > { %v628_v18 = vpop.permute.xlu1 %627  ;;  %1789 = vmatmul.mubr.msk.bf16.vlgmr.msra.gmra.mrb[12].mxu1 %vm683_vm3, %v633_v16 }
 0x33c   : > { %v630_v19 = vsel %vm607_vm2, %v625_v17, %v628_v18  ;;  %1800 = vmatprep.mubr.msk.bf16.mxu1 %vm2016_vm1, %v2015_v8 }
 0x33d   : > { %v634_v20 = vpack.c.bf16 %v630_v19, %v630_v19 }
 0x33f   : > { %1795 = vmatmul.mubr.msk.bf16.vlgmr.msra.gmra.mrb[0].mxu0 %vm683_vm3, %v634_v20 }
 0x340   : > { %1806 = vmatprep.mubr.msk.bf16.mxu0 %vm2016_vm1, %v2015_v8 }
 0x3fa   : > { %v724_v22 = vpop.f32.mrb[4].mxu1 }
 0x3fb   : > { %v868_v23 = vmul.f32 0.35355338, %v724_v22  ;;  %v1778_v25 = vpop.f32.mrb[5].mxu1 }
 0x3fc   : > { %v727_v26 = vpop.f32.mrb[6].mxu1 }
 0x3fd   : > { %v1779_v27 = vpop.f32.mrb[7].mxu1  ;;  %v876_v28 = vsel %vm873_vm4, -10000.0, %v868_v23 }
 0x3fe   : > { %v880_v29 = vsel %vm683_vm3, %v876_v28, -inf }
 0x3ff   : > { %881 = vmax.xlane.f32.xlu0 %v880_v29 }
 0x406   : > { %v770_v30 = vpop.f32.mrb[8].mxu1 }
 0x407   : > { %v869_v31 = vmul.f32 0.35355338, %v770_v30  ;;  %v1784_v32 = vpop.f32.mrb[9].mxu1 }
 0x408   : > { %v773_v33 = vpop.f32.mrb[10].mxu1 }
 0x409   : > { %v1785_v34 = vpop.f32.mrb[11].mxu1  ;;  %v877_v35 = vsel %vm873_vm4, -10000.0, %v869_v31 }
 0x40a   : > { %v883_v36 = vsel %vm683_vm3, %v877_v35, -inf }
 0x40b   : > { %884 = vmax.xlane.f32.xlu1 %v883_v36 }
 0x40e   : > { %v816_v37 = vpop.f32.mrb[12].mxu1 }
 0x40f   : > { %v870_v38 = vmul.f32 0.35355338, %v816_v37  ;;  %v1790_v39 = vpop.f32.mrb[13].mxu1 }
 0x410   : > { %v819_v40 = vpop.f32.mrb[14].mxu1 }
 0x411   : > { %v1791_v41 = vpop.f32.mrb[15].mxu1  ;;  %v878_v42 = vsel %vm873_vm4, -10000.0, %v870_v38 }
 0x412   : > { %v862_v43 = vpop.f32.mrb[0].mxu0  ;;  %v886_v44 = vsel %vm683_vm3, %v878_v42, -inf }
 0x413   : > { %v871_v45 = vmul.f32 0.35355338, %v862_v43  ;;  %887 = vmax.xlane.f32.xlu0 %v886_v44  ;;  %v1796_v46 = vpop.f32.mrb[1].mxu0  ;;  %v1893_v44 = vld [vmem:[%s2441_s7] sm:$0xff]  }
 0x414   : > { %v865_v47 = vpop.f32.mrb[2].mxu0 }
 0x415   : > { %v1797_v48 = vpop.f32.mrb[3].mxu0  ;;  %v879_v49 = vsel %vm873_vm4, -10000.0, %v871_v45  ;;  %v1894_v45 = vld [vmem:[%s2441_s7 + $0x8] sm:$0xff]  }
 0x416   : > { %v889_v50 = vsel %vm683_vm3, %v879_v49, -inf }
 0x417   : > { %890 = vmax.xlane.f32.xlu0 %v889_v50 }
 0x41c   : > { %670 = vrot.lane.b32.xlu1 %v2197_v24, %s2029_s2  ;;  %s2034_s2 = smov 8  }
 0x420   : > { %676 = vrot.lane.b32.xlu1 %v2197_v24, %s2032_s4 }
 0x42d   : > { %673 = vrot.lane.b32.xlu0 %v2197_v24, %s2020_s0  ;;  %s2037_s0 = smov [#allocation2]  }
 0x42e   : > { %s1955_s15 = sshll.u32 %s2037_s0, 4  ;;  %s1956_s15 = int_to_ptr.vmem [resolvable:$false] %s1955_s15 }
 0x42f   : > { %s1957_s17 = scalar_lea.vmem %s1956_s15, 256 }
 0x431   : > { %929 = vrot.lane.b32.xlu0 %v679_v51, %s2033_s16 }
 0x48c   : > { %v882_v55 = vpop.xlane.xlu0 %881 }
 0x48d   : > { %v892_v2 = vsub.f32 %v876_v28, %v882_v55 }
 0x48f   : > { %v896_v6 = vmul.f32 1.442695, %v892_v2 }
 0x498   : > { %v885_v52 = vpop.xlane.xlu1 %884 }
 0x499   : > { %v893_v53 = vsub.f32 %v877_v35, %v885_v52 }
 0x49b   : > { %v898_v54 = vmul.f32 1.442695, %v893_v53 }
 0x49c   : > { %v671_v56 = vpop.permute.xlu1 %670 }
 0x49d   : > { %1925 = vpow2.f32 %v898_v54  ;;  %v680_v57 = vpack.c.bf16 %v671_v56, %v671_v56 }
 0x49f   : > { %979 = vrot.lane.b32.xlu1 %v680_v57, %s2033_s16 }
 0x4a0   : > { %v888_v58 = vpop.xlane.xlu0 %887  ;;  %v677_v11 = vpop.permute.xlu1 %676 }
 0x4a1   : > { %v894_v59 = vsub.f32 %v878_v42, %v888_v58  ;;  %v682_v14 = vpack.c.bf16 %v677_v11, %v677_v11 }
 0x4a3   : > { %v900_v60 = vmul.f32 1.442695, %v894_v59 }
 0x4a4   : > { %v891_v61 = vpop.xlane.xlu0 %890 }
 0x4a5   : > { %1927 = vpow2.f32 %v900_v60  ;;  %v895_v7 = vsub.f32 %v879_v49, %v891_v61 }
 0x4a6   : > { %1929 = vpow2.f32 %v896_v6 }
 0x4a7   : > { %v1926_v62 = vpop.eup %1925  ;;  %v902_v9 = vmul.f32 1.442695, %v895_v7 }
 0x4a8   : > { %v674_v63 = vpop.permute.xlu0 %673  ;;  %v907_v24 = vsel %vm683_vm3, %v1926_v62, 0.0 }
 0x4a9   : > { %908 = vadd.xlane.f32.xlu0 %v907_v24  ;;  %1931 = vpow2.f32 %v902_v9  ;;  %v681_v16 = vpack.c.bf16 %v674_v63, %v674_v63 }
 0x4ac   : > { %v930_v1 = vpop.permute.xlu0 %929 }
 0x4ad   : > { %v936_v3 = vsel %vm934_vm5, %v930_v1, 0 }
 0x4ae   : > { %1799 = vmatpush3.bf16.msra.mxu1 %v936_v3 }
 0x4af   : > { %v1928_v4 = vpop.eup %1927  ;;  %1810 = vmatprep.subr.bf16.mxu1 %v2015_v8 }
 0x4b0   : > { %v910_v5 = vsel %vm683_vm3, %v1928_v4, 0.0  ;;  %v1930_v10 = vpop.eup %1929 }
 0x4b1   : > { %911 = vadd.xlane.f32.xlu0 %v910_v5  ;;  %v904_v12 = vsel %vm683_vm3, %v1930_v10, 0.0 }
 0x4b3   : > { %v1932_v13 = vpop.eup %1931 }
 0x4b4   : > { %v913_v15 = vsel %vm683_vm3, %v1932_v13, 0.0 }
 0x4c3   : > { %905 = vadd.xlane.f32.xlu1 %v904_v12  ;;  %v1900_v12 = vld [vmem:[%s2444_s10 + $0xc] ss:$16 sps:$4 sm:$0xff]  }
 0x4c7   : > { %1077 = vrot.lane.b32.xlu0 %v682_v14, %s2033_s16  ;;  %914 = vadd.xlane.f32.xlu1 %v913_v15  ;;  %v1898_v14 = vld [vmem:[%s2444_s10 + $0x8] ss:$16 sps:$4 sm:$0xff]   ;;  %v1901_v15 = vld [vmem:[%s2444_s10 + $0x20] ss:$16 sps:$4 sm:$0xff]  }
 0x4d8   : > { %1028 = vrot.lane.b32.xlu1 %v681_v16, %s2033_s16  ;;  %v1903_v16 = vld [vmem:[%s2444_s10 + $0x24] ss:$16 sps:$4 sm:$0xff]  }
 0x511   : > { %v980_v17 = vpop.permute.xlu1 %979 }
 0x512   : > { %v985_v18 = vsel %vm934_vm5, %v980_v17, 0  ;;  %v1904_v17 = vld [vmem:[%s2444_s10 + $0x28] ss:$16 sps:$4 sm:$0xff]  }
 0x513   : > { %1805 = vmatpush3.bf16.msra.mxu0 %v985_v18  ;;  %v1906_v18 = vld [vmem:[%s2444_s10 + $0x2c] ss:$16 sps:$4 sm:$0xff]  }
 0x514   : > { %1816 = vmatprep.subr.bf16.mxu0 %v2015_v8 }
 0x536   : > { %v909_v19 = vpop.xlane.xlu0 %908 }
 0x537   : > { %1933 = vrcp.f32 %v909_v19  ;;  %v2036_v19 = vmov 0  }
 0x53e   : > { %v912_v20 = vpop.xlane.xlu0 %911 }
 0x541   : > { %v1934_v21 = vpop.eup %1933 }
 0x542   : > { %v921_v22 = vmul.f32 %v1934_v21, %v1926_v62  ;;  %v1078_v23 = vpop.permute.xlu0 %1077 }
 0x543   : > { %v1083_v26 = vsel %vm934_vm5, %v1078_v23, 0 }
 0x544   : > { %v925_v25 = vpack.c.bf16 %v921_v22, %v921_v22 }
 0x546   : > { %1807 = vmatmul.mubr.msk.bf16.vlgmr.msra.gmra.mrb[4].mxu0 %vm683_vm3, %v925_v25  ;;  %v1688_v25 = vld [vmem:[%s2442_s8] ss:$0 sm:$0xff] }
 0x547   : > { %1817 = vmatpush3.bf16.msra.mxu0 %v1083_v26  ;;  %1818 = vmatprep.mubr.msk.bf16.mxu0 %vm2016_vm1, %v2015_v8 }
 0x550   : > { %v906_v27 = vpop.xlane.xlu1 %905 }
 0x551   : > { %1935 = vrcp.f32 %v906_v27  ;;  %v1689_v27 = vld [vmem:[%s2443_s9] ss:$0 sm:$0xff] }
 0x552   : > { %1937 = vrcp.f32 %v912_v20 }
 0x554   : > { %v915_v28 = vpop.xlane.xlu1 %914 }
 0x555   : > { %1939 = vrcp.f32 %v915_v28 }
 0x558   : > { %v1029_v31 = vpop.permute.xlu1 %1028 }
 0x559   : > { %v1034_v36 = vsel %vm934_vm5, %v1029_v31, 0  ;;  %v1907_v31 = vld [vmem:[%s2445_s11 + $0x40] sm:$0xff]  }
 0x55b   : > { %v1936_v29 = vpop.eup %1935 }
 0x55c   : > { %v920_v30 = vmul.f32 %v1936_v29, %v1930_v10  ;;  %v1938_v32 = vpop.eup %1937 }
 0x55d   : > { %v922_v37 = vmul.f32 %v1938_v32, %v1928_v4  ;;  %v1908_v32 = vld [vmem:[%s2445_s11] sm:$0xff]  }
 0x55e   : > { %v924_v33 = vpack.c.bf16 %v920_v30, %v920_v30 }
 0x55f   : > { %v1940_v34 = vpop.eup %1939  ;;  %v926_v39 = vpack.c.bf16 %v922_v37, %v922_v37  ;;  %v1913_v37 = vld [vmem:[%s2445_s11 + $0x58] sm:$0xff]  }
 0x560   : > { %v923_v35 = vmul.f32 %v1940_v34, %v1932_v13  ;;  %1801 = vmatmul.mubr.msk.bf16.vlgmr.msra.gmra.mrb[16].mxu1 %vm683_vm3, %v924_v33  ;;  %v1895_v13 = vld [vmem:[%s2444_s10] ss:$16 sps:$4 sm:$0xff]   ;;  %v1909_v33 = vld [vmem:[%s2445_s11 + $0x48] sm:$0xff]  }
 0x561   : > { %1811 = vmatpush3.bf16.msra.mxu1 %v1034_v36  ;;  %1812 = vmatprep.mubr.msk.bf16.mxu1 %vm2016_vm1, %v2015_v8  ;;  %v1910_v34 = vld [vmem:[%s2445_s11 + $0x8] sm:$0xff]   ;;  %v1912_v36 = vld [vmem:[%s2445_s11 + $0x10] sm:$0xff]  }
 0x562   : > { %v927_v38 = vpack.c.bf16 %v923_v35, %v923_v35  ;;  %1822 = vmatprep.subr.bf16.mxu1 %v2015_v8  ;;  %v1911_v35 = vld [vmem:[%s2445_s11 + $0x50] sm:$0xff]  }
 0x564   : > { %1819 = vmatmul.mubr.msk.bf16.vlgmr.msra.gmra.mrb[8].mxu0 %vm683_vm3, %v927_v38  ;;  %v1914_v38 = vld [vmem:[%s2445_s11 + $0x18] sm:$0xff]  }
 0x565   : > { %1316 = vmatprep.mubr.bf16.mxu0 %v2036_v19 }
 0x568   : > { %1813 = vmatmul.mubr.msk.bf16.vlgmr.msra.gmra.mrb[20].mxu1 %vm683_vm3, %v926_v39  ;;  %v1915_v39 = vld [vmem:[%s2445_s11 + $0x60] sm:$0xff]  }
 0x569   : > { %1826 = vmatprep.mubr.msk.bf16.mxu1 %vm2016_vm1, %v2015_v8  ;;  %1823 = vmatpush3.bf16.msra.mxu1 %v1893_v44  ;;  %v1920_v44 = vld [vmem:[%s2445_s11 + $0x30] sm:$0xff]  }
 0x56a   : > { %1824 = vmatprep.subr.bf16.mxu1 %v2015_v8 }
 0x56d   : > { %1825 = vmatpush3.bf16.msra.mxu1 %v1894_v45  ;;  %v1921_v45 = vld [vmem:[%s2445_s11 + $0x78] sm:$0xff]  }
 0x56e   : > { %1325 = vmatprep.subr.bf16.mxu1 %v1900_v12 }
 0x619   : > { %v1021_v40 = vpop.f32.mrb[4].mxu0 }
 0x61a   : > { %1126 = vrot.lane.b32.xlu1 %v1021_v40, %s2034_s2  ;;  %v1808_v41 = vpop.f32.mrb[5].mxu0  ;;  %v1916_v40 = vld [vmem:[%s2445_s11 + $0x20] sm:$0xff]   ;;  %s2391_s2 = scalar_lea.hbm %s2446_s12, %s1719_s28 }
 0x61b   : > { %v1024_v42 = vpop.f32.mrb[6].mxu0  ;;  %v1917_v41 = vld [vmem:[%s2445_s11 + $0x68] sm:$0xff]  }
 0x61c   : > { %v1809_v43 = vpop.f32.mrb[7].mxu0  ;;  %v1918_v42 = vld [vmem:[%s2445_s11 + $0x28] sm:$0xff]  }
 0x61d   : > { %v1919_v43 = vld [vmem:[%s2445_s11 + $0x70] sm:$0xff]  }
 0x633   : > { %v972_v46 = vpop.f32.mrb[16].mxu1 }
 0x634   : > { %v1802_v47 = vpop.f32.mrb[17].mxu1 }
 0x635   : > { %v975_v48 = vpop.f32.mrb[18].mxu1 }
 0x636   : > { %v1803_v49 = vpop.f32.mrb[19].mxu1 }
 0x637   : > { %v1119_v50 = vpop.f32.mrb[8].mxu0 }
 0x638   : > { %1134 = vrot.lane.b32.xlu1 %v1119_v50, %s2035_s18  ;;  %v1820_v51 = vpop.f32.mrb[9].mxu0 }
 0x639   : > { %v1122_v52 = vpop.f32.mrb[10].mxu0 }
 0x63a   : > { %v1821_v53 = vpop.f32.mrb[11].mxu0 }
 0x63b   : > { %v1070_v54 = vpop.f32.mrb[20].mxu1 }
 0x63c   : > { %1130 = vrot.lane.b32.xlu0 %v1070_v54, %s2459_s19  ;;  %v1814_v55 = vpop.f32.mrb[21].mxu1  ;;  %s441_s19 = sand.u32 1, %s2005_s22  }
 0x63d   : > { %v1073_v8 = vpop.f32.mrb[22].mxu1  ;;  %s1667_s20 = sshll.u32 %s441_s19, 3  ;;  %s1555_s25 = scalar_lea.sflag [#allocation3], %s441_s19 }
 0x63e   : > { %v1815_v56 = vpop.f32.mrb[23].mxu1  ;;  %s443_s3 = scalar_lea.vmem [#allocation2], %s1667_s20 }
 0x63f   : > { %s1568_s26 = sshll.u32 %s443_s3, 4  ;;  %s2393_s26 = int_to_ptr.vmem [resolvable:$true] %s1568_s26 }
 0x640   : > { %s1951_s4 = scalar_lea.vmem %s2393_s26, 128  ;;  %p1958_p0 = scmp.lt.s32.totalorder %s2393_s26, %s1956_s15 }
 0x641   : > { %p1952_p11 = scmp.ne.s32.totalorder %s2393_s26, %s1951_s4  ;;  %p1959_p1 = scmp.lt.s32.totalorder %s1957_s17, %s1951_s4 }
 0x643   : > { %p1953_p12 = pnand %p1952_p11, %p2141_p5  ;;  %p1960_p2 = por %p1959_p1, %p1958_p0 }
 0x645   : > { %p1954_p13 = pneg %p1953_p12 }
 0x647   : > { %p1961_p3 = pnand %p1960_p2, %p1954_p13 }
 0x68c   : > { %v1127_v57 = vpop.permute.xlu1 %1126 }
 0x68d   : > { %v1137_v58 = vsel %vm683_vm3, %v972_v46, %v1127_v57  ;;  %v1922_v46 = vld [vmem:[%s2445_s11 + $0x38] sm:$0xff]  }
 0x6aa   : > { %v1135_v60 = vpop.permute.xlu1 %1134 }
 0x6ae   : > { %v1131_v59 = vpop.permute.xlu0 %1130 }
 0x6af   : > { %v1139_v61 = vsel %vm1138_vm6, %v1137_v58, %v1131_v59 }
 0x6b0   : > { %v1141_v62 = vsel %vm1140_vm7, %v1139_v61, %v1135_v60 }
 0x6b1   : > { %v1142_v63 = vpack.c.bf16 %v1141_v62, %v1141_v62 }
 0x6b3   : > { %1827 = vmatmul.mubr.msk.bf16.vlgmr.msra.gmra.mrb[24].mxu1 %vm466_vm0, %v1142_v63 }
 0x6b4   : > { %1326 = vmatpush1.bf16.msra.mxu1 %v1898_v14  ;;  %1357 = vmatprep.mubr.bf16.mxu1 %v2036_v19 }
 0x6b5   : > { %1327 = vmatprep.subr.bf16.mxu1 %v1906_v18 }
 0x6b8   : > { %1328 = vmatpush1.bf16.msra.mxu1 %v1904_v17 }
 0x786   : > { %v1196_v24 = vpop.f32.mrb[24].mxu1 }
 0x787   : > { %v2299_v1 = vadd.f32 %v1196_v24, %v2159_v0  ;;  %v1828_v2 = vpop.f32.mrb[25].mxu1  ;;  %v1897_v0 = vld [vmem:[%s2444_s10 + $0x4] ss:$16 sps:$4 sm:$0xff]  }
 0x788   : > { %v1199_v3 = vpop.f32.mrb[26].mxu1  ;;  %1284 = vmatprep.subr.bf16.mxu0 %v1897_v0 }
 0x789   : > { %v1829_v4 = vpop.f32.mrb[27].mxu1  ;;  %v1205_v5 = vsel %vm466_vm0, %v2299_v1, 0.0  ;;  %1285 = vmatpush1.bf16.msra.mxu0 %v1895_v13 }
 0x78a   : > { %1206 = vadd.xlane.f32.xlu0 %v1205_v5  ;;  %1286 = vmatprep.subr.bf16.mxu0 %v1903_v16 }
 0x78d   : > { %1287 = vmatpush1.bf16.msra.mxu0 %v1901_v15 }
 0x78e   : > { %1744 = vmatprep.subr.bf16.mxu0 %v1907_v31 }
 0x817   : > { %v1207_v6 = vpop.xlane.xlu0 %1206 }
 0x818   : > { %v1208_v7 = vmul.f32 0.03125, %v1207_v6 }
 0x81a   : > { %v1209_v9 = vsub.f32 %v2299_v1, %v1208_v7 }
 0x81c   : > { %v1210_v10 = vmul.f32 %v1209_v9, %v1209_v9 }
 0x81e   : > { %v1211_v11 = vsel %vm466_vm0, %v1210_v10, 0.0 }
 0x81f   : > { %1212 = vadd.xlane.f32.xlu1 %v1211_v11 }
 0x8ac   : > { %v1213_v20 = vpop.xlane.xlu1 %1212 }
 0x8ad   : > { %v1214_v21 = vmul.f32 0.03125, %v1213_v20 }
 0x8af   : > { %v1215_v22 = vadd.f32 1e-05, %v1214_v21 }
 0x8b1   : > { %1941 = vrsqrt.f32 %v1215_v22 }
 0x8bb   : > { %v1942_v23 = vpop.eup %1941 }
 0x8bc   : > { %v1217_v26 = vmul.f32 %v1942_v23, %v1209_v9 }
 0x8be   : > { %v1224_v28 = vmul.f32 %v1688_v25, %v1217_v26 }
 0x8c0   : > { %v1231_v29 = vadd.f32 %v1689_v27, %v1224_v28 }
 0x8c2   : > { %v1232_v30 = vpack.c.bf16 %v1231_v29, %v1231_v29 }
 0x8c4   : > { %1698 = vmatmul.mubr.msk.bf16.vlgmr.msra.gmra.mrb[12].mxu0 %vm466_vm0, %v1232_v30  ;;  %1699 = vmatmul.mubr.msk.bf16.vlgmr.msra.gmra.mrb[28].mxu1 %vm466_vm0, %v1232_v30 }
 0x8c5   : > { %1745 = vmatpush3.bf16.msra.mxu0 %v1908_v32 }
 0x8c6   : > { %1746 = vmatprep.subr.bf16.mxu0 %v1909_v33 }
 0x8c9   : > { %1747 = vmatpush3.bf16.msra.mxu0 %v1910_v34 }
 0x8ca   : > { %1748 = vmatprep.subr.bf16.mxu0 %v1911_v35 }
 0x8cd   : > { %1749 = vmatpush3.bf16.msra.mxu0 %v1912_v36 }
 0x8ce   : > { %1750 = vmatprep.subr.bf16.mxu0 %v1913_v37 }
 0x8d1   : > { %1751 = vmatpush3.bf16.msra.mxu0 %v1914_v38 }
 0x8d2   : > { %1752 = vmatprep.subr.bf16.mxu0 %v1915_v39 }
 0x8d5   : > { %1753 = vmatpush3.bf16.msra.mxu0 %v1916_v40 }
 0x8d6   : > { %1754 = vmatprep.subr.bf16.mxu0 %v1917_v41 }
 0x8d9   : > { %1755 = vmatpush3.bf16.msra.mxu0 %v1918_v42 }
 0x8da   : > { %1756 = vmatprep.subr.bf16.mxu0 %v1919_v43 }
 0x8dd   : > { %1757 = vmatpush3.bf16.msra.mxu0 %v1920_v44 }
 0x8de   : > { %1758 = vmatprep.subr.bf16.mxu0 %v1921_v45 }
 0x8e1   : > { %1759 = vmatpush3.bf16.msra.mxu0 %v1922_v46 }
 0x997   : > { %v1318_v47 = vpop.f32.mrb[12].mxu0  ;;  %v1359_v48 = vpop.f32.mrb[28].mxu1 }
 0x998   : > { %v1700_v49 = vmul.f32 -1.442695, %v1318_v47  ;;  %v1320_v50 = vpop.f32.mrb[13].mxu0  ;;  %v1361_v51 = vpop.f32.mrb[29].mxu1 }
 0x999   : > { %v1701_v52 = vmul.f32 -1.442695, %v1320_v50  ;;  %v1322_v53 = vpop.f32.mrb[14].mxu0  ;;  %v1363_v54 = vpop.f32.mrb[30].mxu1 }
 0x99a   : > { %1943 = vpow2.f32 %v1700_v49  ;;  %v1323_v55 = vpop.f32.mrb[15].mxu0  ;;  %v1364_v8 = vpop.f32.mrb[31].mxu1 }
 0x99b   : > { %1945 = vpow2.f32 %v1701_v52 }
 0x9a4   : > { %v1944_v56 = vpop.eup %1943 }
 0x9a5   : > { %v1946_v57 = vpop.eup %1945  ;;  %v1372_v58 = vadd.f32 1.0, %v1944_v56 }
 0x9a6   : > { %v1373_v59 = vadd.f32 1.0, %v1946_v57 }
 0x9a7   : > { %1947 = vrcp.f32 %v1372_v58 }
 0x9a8   : > { %1949 = vrcp.f32 %v1373_v59 }
 0x9b1   : > { %v1948_v60 = vpop.eup %1947 }
 0x9b2   : > { %v1950_v61 = vpop.eup %1949  ;;  %v1378_v62 = vmul.f32 %v1948_v60, %v1318_v47 }
 0x9b3   : > { %v1379_v63 = vmul.f32 %v1950_v61, %v1320_v50 }
 0x9b4   : > { %v1380_v24 = vmul.f32 %v1378_v62, %v1359_v48 }
 0x9b5   : > { %v1381_v2 = vmul.f32 %v1379_v63, %v1361_v51 }
 0x9b6   : > { %v1382_v4 = vpack.c.bf16 %v1380_v24, %v1380_v24 }
 0x9b7   : > { %v1383_v3 = vpack.c.bf16 %v1381_v2, %v1381_v2 }
 0x9b9   : > { %1544 = vmatprep.mubr.bf16.mxu0 %v1383_v3 }
 0x9ba   : > { %1545 = vmatmul.mubr.bf16.vlgmr.msra.gmra.mrb[16].mxu0 %v1382_v4 }
 0xa8d   : > { %v1760_v5 = vpop.f32.mrb[16].mxu0 }
 0xa8e   : > { %v1761_v6 = vpop.f32.mrb[17].mxu0 }
 0xa8f   : > { %v1762_v7 = vadd.f32 %v1761_v6, %v1760_v5  ;;  %v1763_v9 = vpop.f32.mrb[18].mxu0 }
 0xa90   : > { %v1764_v10 = vpop.f32.mrb[19].mxu0 }
 0xa91   : > { %v1552_v11 = vadd.f32 %v1762_v7, %v2299_v1 }
 0xa93   : > { %1553 = vst.msk [vmem:[%s443_s3] sm:$0xff] %vm466_vm0, %v1552_v11 }
 0xa94   : > { %1964 = shalt.err (!%p1961_p3)
}
 0xa95   : > { %s1965_s18 = scalar_lea.hbm %s2391_s2, 128  ;;  %s1969_s28 = scalar_lea.hbm %s2446_s12, 256 }
 0xa96   : > { %p1966_p4 = scmp.ne.s32.totalorder %s2391_s2, %s1965_s18  ;;  %p1970_p9 = scmp.lt.u32.totalorder %s2391_s2, %s2446_s12 }
 0xa97   : > { %p1971_p10 = scmp.lt.u32.totalorder %s1969_s28, %s1965_s18  ;;  %p1973_p12 = scmp.lt.u32.totalorder %s1965_s18, %s2391_s2 }
 0xa98   : > { %p1967_p7 = pnand %p1966_p4, %p2141_p5 }
 0xa99   : > { %p1972_p11 = por %p1971_p10, %p1970_p9 }
 0xa9a   : > { %p1968_p8 = pneg %p1967_p7 }
 0xa9b   : > { %p1974_p13 = por %p1973_p12, %p1972_p11 }
 0xa9d   : > { %p1975_p0 = pnand %p1974_p13, %p1968_p8 }
 0xa9f   : > { %1978 = shalt.err (!%p1975_p0)
}
 0xaa0   : > { %1830 = dma.vmem_to_hbm [thread:$0]  (%p2141_p5), %s2393_s26, 128, %s2391_s2, %s1555_s25  }
 0xaa1 PF: > { %p1836_p1 = scmp.ge.s32.totalorder %s2013_s24, 2  ;;  %s1580_s16 = sand.u32 1, %s2001_s21  }
 0xaa2   : > { %s1581_s4 = scalar_lea.sflag [#allocation3], %s1580_s16 }
 0xaa3   : > { %p1833_p2 = pnand %p1836_p1, %p2145_p6 }
 0xaa5   : > { %1996 = dma.done.wait (!%p1833_p2), %s1581_s4, 128  }
 0xaa6   : > { %1998 = vsyncadd (!%p1833_p2), %s1581_s4, 4294967168  ;;  %p22_p3 = scmp.ge.s32.totalorder %s2128_s27, 4   ;;  %s2460_s21 = smov %s2005_s22 }
 0xaa7   : > { %s2461_s22 = smov %s2009_s23  ;;  %s2462_s23 = smov %s2139_s30 }
 0xaa8   : > { %s2463_s24 = smov %s2128_s27  ;;  %24 = sbr.rel (!%p22_p3) target bundleno = 8 (0x8), region = 112 }
 0xaaf   :  { %1586 = vsyncpa [#allocation3], 1 }
 0xab0   :  { %1588 = vsyncpa [#allocation3 + $0x1], 1 }

</bundles_post_ra>
